<compile_context>
chip_gen: v6e
topology: v6e:2x2x1
jax: 0.10.0
libtpu: 0.0.40
codegen_flags: <defaults>
</compile_context>

<pallas_src>
import functools

import numpy as np
import jax
import jax.numpy as jnp
from jax.experimental import pallas as pl
from jax.experimental.pallas import tpu as pltpu


LEAKY_SLOPE = 0.2     # nn.LeakyReLU(0.2) in the module
BN_EPS = 1e-5         # nn.BatchNorm1d default eps


def _leaky(x):
    return jnp.where(x > 0, x, LEAKY_SLOPE * x)


def _conv3_taps(h_f32, mp_ref, mn_ref, w_ref, matmul_dtype):
    """k=3 'same' conv over batch-major rows as three K=Cin MXU dots.

    prev/next rows come from XLU rolls (f32 sublane rotate); the precomputed
    per-row boundary masks (already in matmul_dtype) zero taps that would
    cross a batch-segment boundary.  No lane-axis concatenation.
    """
    rows = h_f32.shape[0]
    center = h_f32.astype(matmul_dtype)
    prev = pltpu.roll(h_f32, shift=1, axis=0).astype(matmul_dtype) * mp_ref[...]
    nxt = pltpu.roll(h_f32, shift=rows - 1, axis=0).astype(matmul_dtype) * mn_ref[...]
    y = jnp.dot(center, w_ref[1], preferred_element_type=jnp.float32)
    y = y + jnp.dot(prev, w_ref[0], preferred_element_type=jnp.float32)
    y = y + jnp.dot(nxt, w_ref[2], preferred_element_type=jnp.float32)
    return y


# ---------------------------------------------------------------------------
# kernels
# ---------------------------------------------------------------------------
def conv1_stats_kernel(x_ref, w_ref, b_ref, mp_ref, mn_ref,
                       y_ref, s_ref, q_ref, *, matmul_dtype):
    y = _conv3_taps(x_ref[...], mp_ref, mn_ref, w_ref, matmul_dtype) + b_ref[...]
    # BN partial stats from the f32 accumulator (before any downcast)
    s_ref[...] = jnp.sum(y, axis=0, keepdims=True)[None]
    q_ref[...] = jnp.sum(y * y, axis=0, keepdims=True)[None]
    y_ref[...] = y.astype(y_ref.dtype)          # bf16 HBM intermediate


def bn_conv2_stats_kernel(y1_ref, a_ref, c_ref, w_ref, b_ref, mp_ref, mn_ref,
                          y2_ref, s_ref, q_ref, *, matmul_dtype):
    h = _leaky(y1_ref[...].astype(jnp.float32) * a_ref[...] + c_ref[...])  # folded BN1
    y = _conv3_taps(h, mp_ref, mn_ref, w_ref, matmul_dtype) + b_ref[...]
    s_ref[...] = jnp.sum(y, axis=0, keepdims=True)[None]
    q_ref[...] = jnp.sum(y * y, axis=0, keepdims=True)[None]
    y2_ref[...] = y.astype(y2_ref.dtype)


def bn_pool_kernel(y2_ref, a_ref, c_ref, feat_ref, *, seg_len):
    h = _leaky(y2_ref[...].astype(jnp.float32) * a_ref[...] + c_ref[...])  # folded BN2
    rows, ch = h.shape
    feat_ref[...] = jnp.mean(h.reshape(rows // seg_len, seg_len, ch),
                             axis=1)[None]                 # AdaptiveAvgPool1d(1)


def mlp_head_kernel(f_ref, w3_ref, b3_ref, w4_ref, b4_ref, o_ref, *, matmul_dtype):
    f = f_ref[...].astype(matmul_dtype)
    h = _leaky(jnp.dot(f, w3_ref[...], preferred_element_type=jnp.float32)
               + b3_ref[...])
    o_ref[...] = (jnp.dot(h.astype(matmul_dtype), w4_ref[...],
                          preferred_element_type=jnp.float32) + b4_ref[...])


# ---------------------------------------------------------------------------
# wrapper helpers
# ---------------------------------------------------------------------------
def _tpu_vmem_and_cores():
    """(VMEM capacity in bytes, TensorCores per chip) with safe fallbacks."""
    kind = ""
    try:
        kind = jax.devices()[0].device_kind.lower()
    except Exception:  # pragma: no cover
        pass
    n_tc = 2 if "v7" in kind else 1
    cap = None
    try:
        cap = getattr(pltpu.get_tpu_info(), "vmem_capacity_bytes", None)
    except Exception:  # pragma: no cover
        cap = None
    if cap is None:
        cap = (64 << 20) if "v7" in kind else (128 << 20)
    return int(cap), n_tc


def _choose_batches_per_tile(batch, seg_len, per_row_bytes, fixed_bytes,
                             tile_budget, min_steps):
    """Largest batch-aligned row tile under the VMEM budget with >= min_steps
    grid steps (2 per TensorCore) so every core gets double-buffered work."""
    cap = max(1, batch // min_steps) if batch >= min_steps else 1
    best = None
    for d in range(1, cap + 1):
        if batch % d:
            continue
        if (d * seg_len) % 8 and (batch // d) > 1:
            continue  # sublane-unaligned multi-tile block would not lower
        if fixed_bytes + d * seg_len * per_row_bytes > tile_budget:
            continue
        best = d
    if best is None:
        # TODO(synk): awkward L not a multiple of 8 -> fall back to one tile.
        best = 1 if (seg_len % 8 == 0) else batch
    return best


def _bn_affine(s, q, gamma, beta, count):
    # Fold training-mode BatchNorm (biased variance over all B*L rows) into a
    # per-channel scale/shift:  y*a + c == (y - mean) * rsqrt(var+eps) * g + b
    mean = jnp.sum(s, axis=0) / count
    var = jnp.sum(q, axis=0) / count - mean * mean
    a = gamma * jax.lax.rsqrt(var + BN_EPS)
    return a, beta - mean * a


# ---------------------------------------------------------------------------
# wrapper
# ---------------------------------------------------------------------------
def timestep_predictor(x_ncl, params, *, matmul_dtype=jnp.bfloat16,
                       inter_dtype=None):
    """x_ncl: (B, C_in, L) float32, PyTorch NCL layout. Returns (B, n_steps)."""
    if inter_dtype is None:
        inter_dtype = matmul_dtype          # bf16 HBM intermediates by default
    B, Cin, L = x_ncl.shape
    BL = B * L
    C1 = params['w1'].shape[2]
    C2 = params['w2'].shape[2]
    n_steps = params['w4'].shape[1]

    f32b = 4
    mm_bytes = int(np.dtype(matmul_dtype).itemsize)
    ib = int(np.dtype(inter_dtype).itemsize)

    vmem_cap, n_tc = _tpu_vmem_and_cores()
    # per-row VMEM footprint of the heaviest pass (double-buffered I/O tiles +
    # in-kernel tap / accumulator temporaries)
    per_row = max(
        2 * Cin * f32b + 2 * C1 * ib + 3 * Cin * mm_bytes + C1 * f32b,       # pass 1
        2 * C1 * ib + 2 * C2 * ib + 3 * C1 * mm_bytes + (C1 + C2) * f32b,    # pass 2
        2 * C2 * ib + C2 * f32b,                                             # pass 3
    )
    fixed = 2 * 3 * max(Cin * C1, C1 * C2) * mm_bytes + (2 << 20)            # weights+slack
    tile_budget = vmem_cap // 3
    bpt = _choose_batches_per_tile(B, L, per_row, fixed, tile_budget, 2 * n_tc)
    tile_rows = bpt * L
    n_tiles = B // bpt
    need = fixed + tile_rows * per_row
    vmem_limit = int(min(0.9 * vmem_cap, max(2 * need, 32 << 20)))
    par = pltpu.CompilerParams(dimension_semantics=("parallel",),
                               vmem_limit_bytes=vmem_limit)

    # channels-last rows, batch-major
    x2 = jnp.transpose(x_ncl, (0, 2, 1)).reshape(BL, Cin)

    # conv weights kept as (3, Cin, Cout); leading-axis indexing in-kernel is free
    w1 = params['w1'].astype(matmul_dtype)
    w2 = params['w2'].astype(matmul_dtype)
    w3 = params['w3'].astype(matmul_dtype)
    # pad the head to a lane-dense (multiple-of-128) width; slice outside
    NP = ((n_steps + 127) // 128) * 128
    w4p = jnp.zeros((C2, NP), jnp.float32).at[:, :n_steps].set(params['w4'])
    w4p = w4p.astype(matmul_dtype)
    b4p = jnp.zeros((1, NP), jnp.float32).at[:, :n_steps].set(params['b4'])

    # batch-boundary masks for the prev/next conv taps (identical every tile)
    pos = np.arange(tile_rows) % L
    mprev = jnp.asarray((pos > 0).reshape(tile_rows, 1).astype(np.float32),
                        dtype=matmul_dtype)
    mnext = jnp.asarray((pos < L - 1).reshape(tile_rows, 1).astype(np.float32),
                        dtype=matmul_dtype)

    row_spec = lambda w: pl.BlockSpec((tile_rows, w), lambda i: (i, 0))
    full_spec = lambda a: pl.BlockSpec(a.shape, lambda i: (0,) * a.ndim)
    mask_spec = pl.BlockSpec((tile_rows, 1), lambda i: (0, 0))
    stat_spec = lambda w: pl.BlockSpec((1, 1, w), lambda i: (i, 0, 0))
    stat_shape = lambda w: jax.ShapeDtypeStruct((n_tiles, 1, w), jnp.float32)

    # ---- pass 1: conv1 (+ per-tile BN statistics) --------------------------
    y1, s1, q1 = pl.pallas_call(
        functools.partial(conv1_stats_kernel, matmul_dtype=matmul_dtype),
        grid=(n_tiles,),
        in_specs=[row_spec(Cin), full_spec(w1), full_spec(params['b1']),
                  mask_spec, mask_spec],
        out_specs=[row_spec(C1), stat_spec(C1), stat_spec(C1)],
        out_shape=[jax.ShapeDtypeStruct((BL, C1), inter_dtype),
                   stat_shape(C1), stat_shape(C1)],
        compiler_params=par,
        cost_estimate=pl.CostEstimate(
            flops=2 * BL * 3 * Cin * C1, transcendentals=0,
            bytes_accessed=f32b * BL * Cin + ib * BL * C1
            + mm_bytes * 3 * Cin * C1 + 2 * f32b * n_tiles * C1),
    )(x2, w1, params['b1'], mprev, mnext)

    a1, c1 = _bn_affine(s1, q1, params['g1'], params['be1'], BL)

    # ---- pass 2: BN1 + LeakyReLU + conv2 (+ per-tile BN statistics) --------
    y2, s2, q2 = pl.pallas_call(
        functools.partial(bn_conv2_stats_kernel, matmul_dtype=matmul_dtype),
        grid=(n_tiles,),
        in_specs=[row_spec(C1), full_spec(a1), full_spec(c1),
                  full_spec(w2), full_spec(params['b2']), mask_spec, mask_spec],
        out_specs=[row_spec(C2), stat_spec(C2), stat_spec(C2)],
        out_shape=[jax.ShapeDtypeStruct((BL, C2), inter_dtype),
                   stat_shape(C2), stat_shape(C2)],
        compiler_params=par,
        cost_estimate=pl.CostEstimate(
            flops=2 * BL * 3 * C1 * C2, transcendentals=0,
            bytes_accessed=ib * BL * (C1 + C2)
            + mm_bytes * 3 * C1 * C2 + 2 * f32b * n_tiles * C2),
    )(y1, a1, c1, w2, params['b2'], mprev, mnext)

    a2, c2 = _bn_affine(s2, q2, params['g2'], params['be2'], BL)

    # ---- pass 3: BN2 + LeakyReLU + adaptive average pool -------------------
    featp = pl.pallas_call(
        functools.partial(bn_pool_kernel, seg_len=L),
        grid=(n_tiles,),
        in_specs=[row_spec(C2), full_spec(a2), full_spec(c2)],
        out_specs=pl.BlockSpec((1, bpt, C2), lambda i: (i, 0, 0)),
        out_shape=jax.ShapeDtypeStruct((n_tiles, bpt, C2), jnp.float32),
        compiler_params=par,
        cost_estimate=pl.CostEstimate(
            flops=4 * BL * C2, transcendentals=0,
            bytes_accessed=ib * BL * C2 + f32b * B * C2),
    )(y2, a2, c2)
    feat = featp.reshape(B, C2)

    # ---- pass 4: tiny MLP head (whole-VMEM, lane-dense padded output) ------
    vmem = lambda: pl.BlockSpec(memory_space=pltpu.MemorySpace.VMEM)
    out_p = pl.pallas_call(
        functools.partial(mlp_head_kernel, matmul_dtype=matmul_dtype),
        in_specs=[vmem() for _ in range(5)],
        out_specs=vmem(),
        out_shape=jax.ShapeDtypeStruct((B, NP), jnp.float32),
        cost_estimate=pl.CostEstimate(
            flops=2 * B * C2 * (C2 + NP), transcendentals=0,
            bytes_accessed=f32b * B * (C2 + NP) + mm_bytes * C2 * (C2 + NP)),
    )(feat, w3, params['b3'], w4p, b4p)

    return out_p[:, :n_steps]


# ---------------------------------------------------------------------------
# params + pure-JAX reference (same math as the PyTorch module, training BN)
# ---------------------------------------------------------------------------
def init_params(key, in_channels, hidden_dim, n_steps):
    c1, c2 = hidden_dim // 4, hidden_dim // 2
    ks = jax.random.split(key, 8)

    def u(k, shape, fan_in):
        bound = 1.0 / np.sqrt(fan_in)
        return jax.random.uniform(k, shape, jnp.float32, -bound, bound)

    return dict(
        # conv weights stored as (k, Cin, Cout)  (= torch weight[:, :, k].T)
        w1=u(ks[0], (3, in_channels, c1), in_channels * 3),
        b1=u(ks[1], (1, c1), in_channels * 3),
        g1=jnp.ones((1, c1), jnp.float32), be1=jnp.zeros((1, c1), jnp.float32),
        w2=u(ks[2], (3, c1, c2), c1 * 3),
        b2=u(ks[3], (1, c2), c1 * 3),
        g2=jnp.ones((1, c2), jnp.float32), be2=jnp.zeros((1, c2), jnp.float32),
        w3=u(ks[4], (c2, c2), c2), b3=u(ks[5], (1, c2), c2),
        w4=u(ks[6], (c2, n_steps), c2), b4=u(ks[7], (1, n_steps), c2),
    )


def ref_forward(x_ncl, p):
    x = jnp.transpose(x_ncl, (0, 2, 1))  # (B, L, C)

    def conv(h, w, b):
        hp = jnp.pad(h, ((0, 0), (1, 1), (0, 0)))
        return (jnp.einsum('blc,cd->bld', hp[:, :-2], w[0]) +
                jnp.einsum('blc,cd->bld', hp[:, 1:-1], w[1]) +
                jnp.einsum('blc,cd->bld', hp[:, 2:], w[2]) + b[0])

    def bn_lrelu(h, g, be):
        mean = jnp.mean(h, axis=(0, 1), keepdims=True)
        var = jnp.mean((h - mean) ** 2, axis=(0, 1), keepdims=True)
        hn = (h - mean) / jnp.sqrt(var + BN_EPS)
        hn = hn * g[0] + be[0]
        return jnp.where(hn > 0, hn, LEAKY_SLOPE * hn)

    h1 = bn_lrelu(conv(x, p['w1'], p['b1']), p['g1'], p['be1'])
    h2 = bn_lrelu(conv(h1, p['w2'], p['b2']), p['g2'], p['be2'])
    feat = jnp.mean(h2, axis=1)
    f1 = jnp.dot(feat, p['w3']) + p['b3'][0]
    f1 = jnp.where(f1 > 0, f1, LEAKY_SLOPE * f1)
    return jnp.dot(f1, p['w4']) + p['b4'][0]


if __name__ == "__main__":
    key = jax.random.PRNGKey(0)
    kx1, kp1, kx2, kp2 = jax.random.split(key, 4)

    # --- small config (module scaled down): small-channel conv path,
    #     strict f32 comparison (f32 intermediates) -------------------------
    B, in_channels, L = 2, 8, 16
    hidden_dim, n_steps = 32, 20
    x = jax.random.normal(kx1, (B, in_channels, L), jnp.float32)  # NCL layout
    params = init_params(kp1, in_channels, hidden_dim, n_steps)

    fwd_f32 = jax.jit(functools.partial(timestep_predictor,
                                        matmul_dtype=jnp.float32))
    out = jax.block_until_ready(fwd_f32(x, params))
    ref = jax.block_until_ready(ref_forward(x, params))
    assert out.shape == (B, n_steps)
    np.testing.assert_allclose(np.asarray(out), np.asarray(ref),
                               rtol=1e-4, atol=1e-4)

    # --- same config through the bf16 MXU + bf16 HBM-intermediate path
    #     (production default).  BN statistics / accumulation stay f32.
    fwd_bf16 = jax.jit(timestep_predictor)
    out_bf16 = jax.block_until_ready(fwd_bf16(x, params))
    np.testing.assert_allclose(np.asarray(out_bf16), np.asarray(ref),
                               rtol=1e-1, atol=3e-1)

    # --- lane-aligned channels (like the real module, hidden_dim=1024):
    #     exercises the large-channel three-dot conv path ---------------------
    B2, cin2, L2, hd2, ns2 = 2, 128, 16, 512, 64
    x_big = jax.random.normal(kx2, (B2, cin2, L2), jnp.float32)
    p_big = init_params(kp2, cin2, hd2, ns2)
    out_big = jax.block_until_ready(fwd_f32(x_big, p_big))
    ref_big = jax.block_until_ready(ref_forward(x_big, p_big))
    np.testing.assert_allclose(np.asarray(out_big), np.asarray(ref_big),
                               rtol=5e-4, atol=5e-4)

    print("KERNEL_OK")
</pallas_src>

<mosaic_0001>
module attributes {stable_mosaic.version = 11 : i64} {
  func.func @conv1_stats_kernel(%arg0: i32, %arg1: memref<16x8xf32, #tpu.memory_space<vmem>>, %arg2: memref<3x8x8xf32, #tpu.memory_space<vmem>>, %arg3: memref<1x8xf32, #tpu.memory_space<vmem>>, %arg4: memref<16x1xf32, #tpu.memory_space<vmem>>, %arg5: memref<16x1xf32, #tpu.memory_space<vmem>>, %arg6: memref<16x8xf32, #tpu.memory_space<vmem>>, %arg7: memref<1x1x8xf32, #tpu.memory_space<vmem>>, %arg8: memref<1x1x8xf32, #tpu.memory_space<vmem>>) attributes {dimension_semantics = [#tpu.dimension_semantics<parallel>], iteration_bounds = array<i64: 2>, scalar_prefetch = 0 : i64, scratch_operands = 0 : i64, tpu.core_type = #tpu.core_type<tc>, window_params = [{transform_indices = @transform_0, window_bounds = array<i64: 16, 8>}, {pipeline_mode = #tpu.pipeline_mode<synchronous>, transform_indices = @transform_1, window_bounds = array<i64: 3, 8, 8>}, {pipeline_mode = #tpu.pipeline_mode<synchronous>, transform_indices = @transform_2, window_bounds = array<i64: 1, 8>}, {pipeline_mode = #tpu.pipeline_mode<synchronous>, transform_indices = @transform_3, window_bounds = array<i64: 16, 1>}, {pipeline_mode = #tpu.pipeline_mode<synchronous>, transform_indices = @transform_4, window_bounds = array<i64: 16, 1>}, {transform_indices = @transform_5, window_bounds = array<i64: 16, 8>}, {transform_indices = @transform_6, window_bounds = array<i64: 1, 1, 8>}, {transform_indices = @transform_7, window_bounds = array<i64: 1, 1, 8>}]} {
    %c0 = arith.constant 0 : index
    %c0_0 = arith.constant 0 : index
    %0 = vector.load %arg1[%c0, %c0_0] : memref<16x8xf32, #tpu.memory_space<vmem>>, vector<16x8xf32>
    %c1_i32 = arith.constant 1 : i32
    %1 = tpu.dynamic_rotate %0 by %c1_i32 dim 0 : vector<16x8xf32>, i32 -> vector<16x8xf32>
    %c0_1 = arith.constant 0 : index
    %c0_2 = arith.constant 0 : index
    %2 = vector.load %arg4[%c0_1, %c0_2] : memref<16x1xf32, #tpu.memory_space<vmem>>, vector<16x1xf32>
    %3 = vector.broadcast %2 : vector<16x1xf32> to vector<16x8xf32>
    %4 = arith.mulf %1, %3 : vector<16x8xf32>
    %c15_i32 = arith.constant 15 : i32
    %5 = tpu.dynamic_rotate %0 by %c15_i32 dim 0 : vector<16x8xf32>, i32 -> vector<16x8xf32>
    %c0_3 = arith.constant 0 : index
    %c0_4 = arith.constant 0 : index
    %6 = vector.load %arg5[%c0_3, %c0_4] : memref<16x1xf32, #tpu.memory_space<vmem>>, vector<16x1xf32>
    %7 = vector.broadcast %6 : vector<16x1xf32> to vector<16x8xf32>
    %8 = arith.mulf %5, %7 : vector<16x8xf32>
    %c1 = arith.constant 1 : index
    %c0_5 = arith.constant 0 : index
    %c0_6 = arith.constant 0 : index
    %9 = vector.load %arg2[%c1, %c0_5, %c0_6] : memref<3x8x8xf32, #tpu.memory_space<vmem>>, vector<1x8x8xf32>
    %10 = vector.shape_cast %9 : vector<1x8x8xf32> to vector<8x8xf32>
    %cst = arith.constant dense<0.000000e+00> : vector<16x8xf32>
    %11 = tpu.matmul %0, %10, %cst {dimension_numbers = #tpu.dot_dimension_numbers<[1], [0], [0], [1], [0, 0, 1, 1], [], []>} : vector<16x8xf32>, vector<8x8xf32>, vector<16x8xf32> -> vector<16x8xf32>
    %c0_7 = arith.constant 0 : index
    %c0_8 = arith.constant 0 : index
    %c0_9 = arith.constant 0 : index
    %12 = vector.load %arg2[%c0_7, %c0_8, %c0_9] : memref<3x8x8xf32, #tpu.memory_space<vmem>>, vector<1x8x8xf32>
    %13 = vector.shape_cast %12 : vector<1x8x8xf32> to vector<8x8xf32>
    %cst_10 = arith.constant dense<0.000000e+00> : vector<16x8xf32>
    %14 = tpu.matmul %4, %13, %cst_10 {dimension_numbers = #tpu.dot_dimension_numbers<[1], [0], [0], [1], [0, 0, 1, 1], [], []>} : vector<16x8xf32>, vector<8x8xf32>, vector<16x8xf32> -> vector<16x8xf32>
    %15 = arith.addf %11, %14 : vector<16x8xf32>
    %c2 = arith.constant 2 : index
    %c0_11 = arith.constant 0 : index
    %c0_12 = arith.constant 0 : index
    %16 = vector.load %arg2[%c2, %c0_11, %c0_12] : memref<3x8x8xf32, #tpu.memory_space<vmem>>, vector<1x8x8xf32>
    %17 = vector.shape_cast %16 : vector<1x8x8xf32> to vector<8x8xf32>
    %cst_13 = arith.constant dense<0.000000e+00> : vector<16x8xf32>
    %18 = tpu.matmul %8, %17, %cst_13 {dimension_numbers = #tpu.dot_dimension_numbers<[1], [0], [0], [1], [0, 0, 1, 1], [], []>} : vector<16x8xf32>, vector<8x8xf32>, vector<16x8xf32> -> vector<16x8xf32>
    %19 = arith.addf %15, %18 : vector<16x8xf32>
    %c0_14 = arith.constant 0 : index
    %c0_15 = arith.constant 0 : index
    %20 = vector.load %arg3[%c0_14, %c0_15] : memref<1x8xf32, #tpu.memory_space<vmem>>, vector<1x8xf32>
    %21 = vector.broadcast %20 : vector<1x8xf32> to vector<16x8xf32>
    %22 = arith.addf %19, %21 : vector<16x8xf32>
    %cst_16 = arith.constant dense<0.000000e+00> : vector<8xf32>
    %23 = vector.multi_reduction <add>, %22, %cst_16 [0] : vector<16x8xf32> to vector<8xf32>
    %24 = vector.shape_cast %23 : vector<8xf32> to vector<1x8xf32>
    %25 = vector.shape_cast %24 : vector<1x8xf32> to vector<1x1x8xf32>
    %c0_17 = arith.constant 0 : index
    %c0_18 = arith.constant 0 : index
    %c0_19 = arith.constant 0 : index
    %26 = vector.load %arg7[%c0_17, %c0_18, %c0_19] : memref<1x1x8xf32, #tpu.memory_space<vmem>>, vector<1x1x8xf32>
    tpu.vector_store %arg7[%c0_17, %c0_18, %c0_19], %25 {strides = array<i32>} : memref<1x1x8xf32, #tpu.memory_space<vmem>>, vector<1x1x8xf32>,
    %27 = arith.mulf %22, %22 : vector<16x8xf32>
    %cst_20 = arith.constant dense<0.000000e+00> : vector<8xf32>
    %28 = vector.multi_reduction <add>, %27, %cst_20 [0] : vector<16x8xf32> to vector<8xf32>
    %29 = vector.shape_cast %28 : vector<8xf32> to vector<1x8xf32>
    %30 = vector.shape_cast %29 : vector<1x8xf32> to vector<1x1x8xf32>
    %c0_21 = arith.constant 0 : index
    %c0_22 = arith.constant 0 : index
    %c0_23 = arith.constant 0 : index
    %31 = vector.load %arg8[%c0_21, %c0_22, %c0_23] : memref<1x1x8xf32, #tpu.memory_space<vmem>>, vector<1x1x8xf32>
    tpu.vector_store %arg8[%c0_21, %c0_22, %c0_23], %30 {strides = array<i32>} : memref<1x1x8xf32, #tpu.memory_space<vmem>>, vector<1x1x8xf32>,
    %c0_24 = arith.constant 0 : index
    %c0_25 = arith.constant 0 : index
    %32 = vector.load %arg6[%c0_24, %c0_25] : memref<16x8xf32, #tpu.memory_space<vmem>>, vector<16x8xf32>
    tpu.vector_store %arg6[%c0_24, %c0_25], %22 {strides = array<i32>} : memref<16x8xf32, #tpu.memory_space<vmem>>, vector<16x8xf32>,
    return
  }
  func.func @transform_0(%arg0: i32) -> (i32, i32) {
    %c0_i32 = arith.constant 0 : i32
    %c0_i32_0 = arith.constant 0 : i32
    return %arg0, %c0_i32 : i32, i32
  }
  func.func @transform_1(%arg0: i32) -> (i32, i32, i32) {
    %c0_i32 = arith.constant 0 : i32
    %c0_i32_0 = arith.constant 0 : i32
    %c0_i32_1 = arith.constant 0 : i32
    %c0_i32_2 = arith.constant 0 : i32
    return %c0_i32, %c0_i32_0, %c0_i32_1 : i32, i32, i32
  }
  func.func @transform_2(%arg0: i32) -> (i32, i32) {
    %c0_i32 = arith.constant 0 : i32
    %c0_i32_0 = arith.constant 0 : i32
    %c0_i32_1 = arith.constant 0 : i32
    return %c0_i32, %c0_i32_0 : i32, i32
  }
  func.func @transform_3(%arg0: i32) -> (i32, i32) {
    %c0_i32 = arith.constant 0 : i32
    %c0_i32_0 = arith.constant 0 : i32
    %c0_i32_1 = arith.constant 0 : i32
    return %c0_i32, %c0_i32_0 : i32, i32
  }
  func.func @transform_4(%arg0: i32) -> (i32, i32) {
    %c0_i32 = arith.constant 0 : i32
    %c0_i32_0 = arith.constant 0 : i32
    %c0_i32_1 = arith.constant 0 : i32
    return %c0_i32, %c0_i32_0 : i32, i32
  }
  func.func @transform_5(%arg0: i32) -> (i32, i32) {
    %c0_i32 = arith.constant 0 : i32
    %c0_i32_0 = arith.constant 0 : i32
    return %arg0, %c0_i32 : i32, i32
  }
  func.func @transform_6(%arg0: i32) -> (i32, i32, i32) {
    %c0_i32 = arith.constant 0 : i32
    %c0_i32_0 = arith.constant 0 : i32
    %c0_i32_1 = arith.constant 0 : i32
    return %arg0, %c0_i32, %c0_i32_0 : i32, i32, i32
  }
  func.func @transform_7(%arg0: i32) -> (i32, i32, i32) {
    %c0_i32 = arith.constant 0 : i32
    %c0_i32_0 = arith.constant 0 : i32
    %c0_i32_1 = arith.constant 0 : i32
    return %arg0, %c0_i32, %c0_i32_0 : i32, i32, i32
  }
}

module attributes {stable_mosaic.version = 11 : i64} {
  func.func @bn_pool_kernel(%arg0: i32, %arg1: memref<16x16xf32, #tpu.memory_space<vmem>>, %arg2: memref<1x16xf32, #tpu.memory_space<vmem>>, %arg3: memref<1x16xf32, #tpu.memory_space<vmem>>, %arg4: memref<1x1x16xf32, #tpu.memory_space<vmem>>) attributes {dimension_semantics = [#tpu.dimension_semantics<parallel>], iteration_bounds = array<i64: 2>, scalar_prefetch = 0 : i64, scratch_operands = 0 : i64, tpu.core_type = #tpu.core_type<tc>, window_params = [{transform_indices = @transform_0, window_bounds = array<i64: 16, 16>}, {pipeline_mode = #tpu.pipeline_mode<synchronous>, transform_indices = @transform_1, window_bounds = array<i64: 1, 16>}, {pipeline_mode = #tpu.pipeline_mode<synchronous>, transform_indices = @transform_2, window_bounds = array<i64: 1, 16>}, {transform_indices = @transform_3, window_bounds = array<i64: 1, 1, 16>}]} {
    %c0 = arith.constant 0 : index
    %c0_0 = arith.constant 0 : index
    %0 = vector.load %arg1[%c0, %c0_0] : memref<16x16xf32, #tpu.memory_space<vmem>>, vector<16x16xf32>
    %c0_1 = arith.constant 0 : index
    %c0_2 = arith.constant 0 : index
    %1 = vector.load %arg2[%c0_1, %c0_2] : memref<1x16xf32, #tpu.memory_space<vmem>>, vector<1x16xf32>
    %2 = vector.broadcast %1 : vector<1x16xf32> to vector<16x16xf32>
    %3 = arith.mulf %0, %2 : vector<16x16xf32>
    %c0_3 = arith.constant 0 : index
    %c0_4 = arith.constant 0 : index
    %4 = vector.load %arg3[%c0_3, %c0_4] : memref<1x16xf32, #tpu.memory_space<vmem>>, vector<1x16xf32>
    %5 = vector.broadcast %4 : vector<1x16xf32> to vector<16x16xf32>
    %6 = arith.addf %3, %5 : vector<16x16xf32>
    %cst = arith.constant 0.000000e+00 : f32
    %7 = vector.broadcast %cst : f32 to vector<16x16xf32>
    %8 = arith.cmpf ogt, %6, %7 : vector<16x16xf32>
    %cst_5 = arith.constant 2.000000e-01 : f32
    %9 = vector.broadcast %cst_5 : f32 to vector<16x16xf32>
    %10 = arith.mulf %9, %6 : vector<16x16xf32>
    %11 = arith.select %8, %6, %10 : vector<16x16xi1>, vector<16x16xf32>
    %12 = vector.shape_cast %11 : vector<16x16xf32> to vector<1x16x16xf32>
    %cst_6 = arith.constant dense<0.000000e+00> : vector<1x16xf32>
    %13 = vector.multi_reduction <add>, %12, %cst_6 [1] : vector<1x16x16xf32> to vector<1x16xf32>
    %cst_7 = arith.constant 1.600000e+01 : f32
    %14 = vector.broadcast %cst_7 : f32 to vector<1x16xf32>
    %15 = arith.divf %13, %14 : vector<1x16xf32>
    %16 = vector.shape_cast %15 : vector<1x16xf32> to vector<1x1x16xf32>
    %c0_8 = arith.constant 0 : index
    %c0_9 = arith.constant 0 : index
    %c0_10 = arith.constant 0 : index
    %17 = vector.load %arg4[%c0_8, %c0_9, %c0_10] : memref<1x1x16xf32, #tpu.memory_space<vmem>>, vector<1x1x16xf32>
    tpu.vector_store %arg4[%c0_8, %c0_9, %c0_10], %16 {strides = array<i32>} : memref<1x1x16xf32, #tpu.memory_space<vmem>>, vector<1x1x16xf32>,
    return
  }
  func.func @transform_0(%arg0: i32) -> (i32, i32) {
    %c0_i32 = arith.constant 0 : i32
    %c0_i32_0 = arith.constant 0 : i32
    return %arg0, %c0_i32 : i32, i32
  }
  func.func @transform_1(%arg0: i32) -> (i32, i32) {
    %c0_i32 = arith.constant 0 : i32
    %c0_i32_0 = arith.constant 0 : i32
    %c0_i32_1 = arith.constant 0 : i32
    return %c0_i32, %c0_i32_0 : i32, i32
  }
  func.func @transform_2(%arg0: i32) -> (i32, i32) {
    %c0_i32 = arith.constant 0 : i32
    %c0_i32_0 = arith.constant 0 : i32
    %c0_i32_1 = arith.constant 0 : i32
    return %c0_i32, %c0_i32_0 : i32, i32
  }
  func.func @transform_3(%arg0: i32) -> (i32, i32, i32) {
    %c0_i32 = arith.constant 0 : i32
    %c0_i32_0 = arith.constant 0 : i32
    %c0_i32_1 = arith.constant 0 : i32
    return %arg0, %c0_i32, %c0_i32_0 : i32, i32, i32
  }
}

module attributes {stable_mosaic.version = 11 : i64} {
  func.func @bn_conv2_stats_kernel(%arg0: i32, %arg1: memref<16x8xf32, #tpu.memory_space<vmem>>, %arg2: memref<1x8xf32, #tpu.memory_space<vmem>>, %arg3: memref<1x8xf32, #tpu.memory_space<vmem>>, %arg4: memref<3x8x16xf32, #tpu.memory_space<vmem>>, %arg5: memref<1x16xf32, #tpu.memory_space<vmem>>, %arg6: memref<16x1xf32, #tpu.memory_space<vmem>>, %arg7: memref<16x1xf32, #tpu.memory_space<vmem>>, %arg8: memref<16x16xf32, #tpu.memory_space<vmem>>, %arg9: memref<1x1x16xf32, #tpu.memory_space<vmem>>, %arg10: memref<1x1x16xf32, #tpu.memory_space<vmem>>) attributes {dimension_semantics = [#tpu.dimension_semantics<parallel>], iteration_bounds = array<i64: 2>, scalar_prefetch = 0 : i64, scratch_operands = 0 : i64, tpu.core_type = #tpu.core_type<tc>, window_params = [{transform_indices = @transform_0, window_bounds = array<i64: 16, 8>}, {pipeline_mode = #tpu.pipeline_mode<synchronous>, transform_indices = @transform_1, window_bounds = array<i64: 1, 8>}, {pipeline_mode = #tpu.pipeline_mode<synchronous>, transform_indices = @transform_2, window_bounds = array<i64: 1, 8>}, {pipeline_mode = #tpu.pipeline_mode<synchronous>, transform_indices = @transform_3, window_bounds = array<i64: 3, 8, 16>}, {pipeline_mode = #tpu.pipeline_mode<synchronous>, transform_indices = @transform_4, window_bounds = array<i64: 1, 16>}, {pipeline_mode = #tpu.pipeline_mode<synchronous>, transform_indices = @transform_5, window_bounds = array<i64: 16, 1>}, {pipeline_mode = #tpu.pipeline_mode<synchronous>, transform_indices = @transform_6, window_bounds = array<i64: 16, 1>}, {transform_indices = @transform_7, window_bounds = array<i64: 16, 16>}, {transform_indices = @transform_8, window_bounds = array<i64: 1, 1, 16>}, {transform_indices = @transform_9, window_bounds = array<i64: 1, 1, 16>}]} {
    %c0 = arith.constant 0 : index
    %c0_0 = arith.constant 0 : index
    %0 = vector.load %arg1[%c0, %c0_0] : memref<16x8xf32, #tpu.memory_space<vmem>>, vector<16x8xf32>
    %c0_1 = arith.constant 0 : index
    %c0_2 = arith.constant 0 : index
    %1 = vector.load %arg2[%c0_1, %c0_2] : memref<1x8xf32, #tpu.memory_space<vmem>>, vector<1x8xf32>
    %2 = vector.broadcast %1 : vector<1x8xf32> to vector<16x8xf32>
    %3 = arith.mulf %0, %2 : vector<16x8xf32>
    %c0_3 = arith.constant 0 : index
    %c0_4 = arith.constant 0 : index
    %4 = vector.load %arg3[%c0_3, %c0_4] : memref<1x8xf32, #tpu.memory_space<vmem>>, vector<1x8xf32>
    %5 = vector.broadcast %4 : vector<1x8xf32> to vector<16x8xf32>
    %6 = arith.addf %3, %5 : vector<16x8xf32>
    %cst = arith.constant 0.000000e+00 : f32
    %7 = vector.broadcast %cst : f32 to vector<16x8xf32>
    %8 = arith.cmpf ogt, %6, %7 : vector<16x8xf32>
    %cst_5 = arith.constant 2.000000e-01 : f32
    %9 = vector.broadcast %cst_5 : f32 to vector<16x8xf32>
    %10 = arith.mulf %9, %6 : vector<16x8xf32>
    %11 = arith.select %8, %6, %10 : vector<16x8xi1>, vector<16x8xf32>
    %c1_i32 = arith.constant 1 : i32
    %12 = tpu.dynamic_rotate %11 by %c1_i32 dim 0 : vector<16x8xf32>, i32 -> vector<16x8xf32>
    %c0_6 = arith.constant 0 : index
    %c0_7 = arith.constant 0 : index
    %13 = vector.load %arg6[%c0_6, %c0_7] : memref<16x1xf32, #tpu.memory_space<vmem>>, vector<16x1xf32>
    %14 = vector.broadcast %13 : vector<16x1xf32> to vector<16x8xf32>
    %15 = arith.mulf %12, %14 : vector<16x8xf32>
    %c15_i32 = arith.constant 15 : i32
    %16 = tpu.dynamic_rotate %11 by %c15_i32 dim 0 : vector<16x8xf32>, i32 -> vector<16x8xf32>
    %c0_8 = arith.constant 0 : index
    %c0_9 = arith.constant 0 : index
    %17 = vector.load %arg7[%c0_8, %c0_9] : memref<16x1xf32, #tpu.memory_space<vmem>>, vector<16x1xf32>
    %18 = vector.broadcast %17 : vector<16x1xf32> to vector<16x8xf32>
    %19 = arith.mulf %16, %18 : vector<16x8xf32>
    %c1 = arith.constant 1 : index
    %c0_10 = arith.constant 0 : index
    %c0_11 = arith.constant 0 : index
    %20 = vector.load %arg4[%c1, %c0_10, %c0_11] : memref<3x8x16xf32, #tpu.memory_space<vmem>>, vector<1x8x16xf32>
    %21 = vector.shape_cast %20 : vector<1x8x16xf32> to vector<8x16xf32>
    %cst_12 = arith.constant dense<0.000000e+00> : vector<16x16xf32>
    %22 = tpu.matmul %11, %21, %cst_12 {dimension_numbers = #tpu.dot_dimension_numbers<[1], [0], [0], [1], [0, 0, 1, 1], [], []>} : vector<16x8xf32>, vector<8x16xf32>, vector<16x16xf32> -> vector<16x16xf32>
    %c0_13 = arith.constant 0 : index
    %c0_14 = arith.constant 0 : index
    %c0_15 = arith.constant 0 : index
    %23 = vector.load %arg4[%c0_13, %c0_14, %c0_15] : memref<3x8x16xf32, #tpu.memory_space<vmem>>, vector<1x8x16xf32>
    %24 = vector.shape_cast %23 : vector<1x8x16xf32> to vector<8x16xf32>
    %cst_16 = arith.constant dense<0.000000e+00> : vector<16x16xf32>
    %25 = tpu.matmul %15, %24, %cst_16 {dimension_numbers = #tpu.dot_dimension_numbers<[1], [0], [0], [1], [0, 0, 1, 1], [], []>} : vector<16x8xf32>, vector<8x16xf32>, vector<16x16xf32> -> vector<16x16xf32>
    %26 = arith.addf %22, %25 : vector<16x16xf32>
    %c2 = arith.constant 2 : index
    %c0_17 = arith.constant 0 : index
    %c0_18 = arith.constant 0 : index
    %27 = vector.load %arg4[%c2, %c0_17, %c0_18] : memref<3x8x16xf32, #tpu.memory_space<vmem>>, vector<1x8x16xf32>
    %28 = vector.shape_cast %27 : vector<1x8x16xf32> to vector<8x16xf32>
    %cst_19 = arith.constant dense<0.000000e+00> : vector<16x16xf32>
    %29 = tpu.matmul %19, %28, %cst_19 {dimension_numbers = #tpu.dot_dimension_numbers<[1], [0], [0], [1], [0, 0, 1, 1], [], []>} : vector<16x8xf32>, vector<8x16xf32>, vector<16x16xf32> -> vector<16x16xf32>
    %30 = arith.addf %26, %29 : vector<16x16xf32>
    %c0_20 = arith.constant 0 : index
    %c0_21 = arith.constant 0 : index
    %31 = vector.load %arg5[%c0_20, %c0_21] : memref<1x16xf32, #tpu.memory_space<vmem>>, vector<1x16xf32>
    %32 = vector.broadcast %31 : vector<1x16xf32> to vector<16x16xf32>
    %33 = arith.addf %30, %32 : vector<16x16xf32>
    %cst_22 = arith.constant dense<0.000000e+00> : vector<16xf32>
    %34 = vector.multi_reduction <add>, %33, %cst_22 [0] : vector<16x16xf32> to vector<16xf32>
    %35 = vector.shape_cast %34 : vector<16xf32> to vector<1x16xf32>
    %36 = vector.shape_cast %35 : vector<1x16xf32> to vector<1x1x16xf32>
    %c0_23 = arith.constant 0 : index
    %c0_24 = arith.constant 0 : index
    %c0_25 = arith.constant 0 : index
    %37 = vector.load %arg9[%c0_23, %c0_24, %c0_25] : memref<1x1x16xf32, #tpu.memory_space<vmem>>, vector<1x1x16xf32>
    tpu.vector_store %arg9[%c0_23, %c0_24, %c0_25], %36 {strides = array<i32>} : memref<1x1x16xf32, #tpu.memory_space<vmem>>, vector<1x1x16xf32>,
    %38 = arith.mulf %33, %33 : vector<16x16xf32>
    %cst_26 = arith.constant dense<0.000000e+00> : vector<16xf32>
    %39 = vector.multi_reduction <add>, %38, %cst_26 [0] : vector<16x16xf32> to vector<16xf32>
    %40 = vector.shape_cast %39 : vector<16xf32> to vector<1x16xf32>
    %41 = vector.shape_cast %40 : vector<1x16xf32> to vector<1x1x16xf32>
    %c0_27 = arith.constant 0 : index
    %c0_28 = arith.constant 0 : index
    %c0_29 = arith.constant 0 : index
    %42 = vector.load %arg10[%c0_27, %c0_28, %c0_29] : memref<1x1x16xf32, #tpu.memory_space<vmem>>, vector<1x1x16xf32>
    tpu.vector_store %arg10[%c0_27, %c0_28, %c0_29], %41 {strides = array<i32>} : memref<1x1x16xf32, #tpu.memory_space<vmem>>, vector<1x1x16xf32>,
    %c0_30 = arith.constant 0 : index
    %c0_31 = arith.constant 0 : index
    %43 = vector.load %arg8[%c0_30, %c0_31] : memref<16x16xf32, #tpu.memory_space<vmem>>, vector<16x16xf32>
    tpu.vector_store %arg8[%c0_30, %c0_31], %33 {strides = array<i32>} : memref<16x16xf32, #tpu.memory_space<vmem>>, vector<16x16xf32>,
    return
  }
  func.func @transform_0(%arg0: i32) -> (i32, i32) {
    %c0_i32 = arith.constant 0 : i32
    %c0_i32_0 = arith.constant 0 : i32
    return %arg0, %c0_i32 : i32, i32
  }
  func.func @transform_1(%arg0: i32) -> (i32, i32) {
    %c0_i32 = arith.constant 0 : i32
    %c0_i32_0 = arith.constant 0 : i32
    %c0_i32_1 = arith.constant 0 : i32
    return %c0_i32, %c0_i32_0 : i32, i32
  }
  func.func @transform_2(%arg0: i32) -> (i32, i32) {
    %c0_i32 = arith.constant 0 : i32
    %c0_i32_0 = arith.constant 0 : i32
    %c0_i32_1 = arith.constant 0 : i32
    return %c0_i32, %c0_i32_0 : i32, i32
  }
  func.func @transform_3(%arg0: i32) -> (i32, i32, i32) {
    %c0_i32 = arith.constant 0 : i32
    %c0_i32_0 = arith.constant 0 : i32
    %c0_i32_1 = arith.constant 0 : i32
    %c0_i32_2 = arith.constant 0 : i32
    return %c0_i32, %c0_i32_0, %c0_i32_1 : i32, i32, i32
  }
  func.func @transform_4(%arg0: i32) -> (i32, i32) {
    %c0_i32 = arith.constant 0 : i32
    %c0_i32_0 = arith.constant 0 : i32
    %c0_i32_1 = arith.constant 0 : i32
    return %c0_i32, %c0_i32_0 : i32, i32
  }
  func.func @transform_5(%arg0: i32) -> (i32, i32) {
    %c0_i32 = arith.constant 0 : i32
    %c0_i32_0 = arith.constant 0 : i32
    %c0_i32_1 = arith.constant 0 : i32
    return %c0_i32, %c0_i32_0 : i32, i32
  }
  func.func @transform_6(%arg0: i32) -> (i32, i32) {
    %c0_i32 = arith.constant 0 : i32
    %c0_i32_0 = arith.constant 0 : i32
    %c0_i32_1 = arith.constant 0 : i32
    return %c0_i32, %c0_i32_0 : i32, i32
  }
  func.func @transform_7(%arg0: i32) -> (i32, i32) {
    %c0_i32 = arith.constant 0 : i32
    %c0_i32_0 = arith.constant 0 : i32
    return %arg0, %c0_i32 : i32, i32
  }
  func.func @transform_8(%arg0: i32) -> (i32, i32, i32) {
    %c0_i32 = arith.constant 0 : i32
    %c0_i32_0 = arith.constant 0 : i32
    %c0_i32_1 = arith.constant 0 : i32
    return %arg0, %c0_i32, %c0_i32_0 : i32, i32, i32
  }
  func.func @transform_9(%arg0: i32) -> (i32, i32, i32) {
    %c0_i32 = arith.constant 0 : i32
    %c0_i32_0 = arith.constant 0 : i32
    %c0_i32_1 = arith.constant 0 : i32
    return %arg0, %c0_i32, %c0_i32_0 : i32, i32, i32
  }
}

module attributes {stable_mosaic.version = 11 : i64} {
  func.func @mlp_head_kernel(%arg0: memref<2x16xf32, #tpu.memory_space<vmem>>, %arg1: memref<16x16xf32, #tpu.memory_space<vmem>>, %arg2: memref<1x16xf32, #tpu.memory_space<vmem>>, %arg3: memref<16x128xf32, #tpu.memory_space<vmem>>, %arg4: memref<1x128xf32, #tpu.memory_space<vmem>>, %arg5: memref<2x128xf32, #tpu.memory_space<vmem>>) attributes {dimension_semantics = [], scalar_prefetch = 0 : i64, scratch_operands = 0 : i64, tpu.core_type = #tpu.core_type<tc>} {
    %c0 = arith.constant 0 : index
    %c0_0 = arith.constant 0 : index
    %0 = vector.load %arg0[%c0, %c0_0] : memref<2x16xf32, #tpu.memory_space<vmem>>, vector<2x16xf32>
    %c0_1 = arith.constant 0 : index
    %c0_2 = arith.constant 0 : index
    %1 = vector.load %arg1[%c0_1, %c0_2] : memref<16x16xf32, #tpu.memory_space<vmem>>, vector<16x16xf32>
    %cst = arith.constant dense<0.000000e+00> : vector<2x16xf32>
    %2 = tpu.matmul %0, %1, %cst {dimension_numbers = #tpu.dot_dimension_numbers<[1], [0], [0], [1], [0, 0, 1, 1], [], []>} : vector<2x16xf32>, vector<16x16xf32>, vector<2x16xf32> -> vector<2x16xf32>
    %c0_3 = arith.constant 0 : index
    %c0_4 = arith.constant 0 : index
    %3 = vector.load %arg2[%c0_3, %c0_4] : memref<1x16xf32, #tpu.memory_space<vmem>>, vector<1x16xf32>
    %4 = vector.broadcast %3 : vector<1x16xf32> to vector<2x16xf32>
    %5 = arith.addf %2, %4 : vector<2x16xf32>
    %cst_5 = arith.constant 0.000000e+00 : f32
    %6 = vector.broadcast %cst_5 : f32 to vector<2x16xf32>
    %7 = arith.cmpf ogt, %5, %6 : vector<2x16xf32>
    %cst_6 = arith.constant 2.000000e-01 : f32
    %8 = vector.broadcast %cst_6 : f32 to vector<2x16xf32>
    %9 = arith.mulf %8, %5 : vector<2x16xf32>
    %10 = arith.select %7, %5, %9 : vector<2x16xi1>, vector<2x16xf32>
    %c0_7 = arith.constant 0 : index
    %c0_8 = arith.constant 0 : index
    %11 = vector.load %arg3[%c0_7, %c0_8] : memref<16x128xf32, #tpu.memory_space<vmem>>, vector<16x128xf32>
    %cst_9 = arith.constant dense<0.000000e+00> : vector<2x128xf32>
    %12 = tpu.matmul %10, %11, %cst_9 {dimension_numbers = #tpu.dot_dimension_numbers<[1], [0], [0], [1], [0, 0, 1, 1], [], []>} : vector<2x16xf32>, vector<16x128xf32>, vector<2x128xf32> -> vector<2x128xf32>
    %c0_10 = arith.constant 0 : index
    %c0_11 = arith.constant 0 : index
    %13 = vector.load %arg4[%c0_10, %c0_11] : memref<1x128xf32, #tpu.memory_space<vmem>>, vector<1x128xf32>
    %14 = vector.broadcast %13 : vector<1x128xf32> to vector<2x128xf32>
    %15 = arith.addf %12, %14 : vector<2x128xf32>
    %c0_12 = arith.constant 0 : index
    %c0_13 = arith.constant 0 : index
    %16 = vector.load %arg5[%c0_12, %c0_13] : memref<2x128xf32, #tpu.memory_space<vmem>>, vector<2x128xf32>
    tpu.vector_store %arg5[%c0_12, %c0_13], %15 {strides = array<i32>} : memref<2x128xf32, #tpu.memory_space<vmem>>, vector<2x128xf32>,
    return
  }
}

</mosaic_0001>

<bundles_post_ra>
// kernel: timestep_predictor.6
= control target key start
LH: loop header
LB: loop body
LE: loop exit
PB: predicated region body
PF: predicated region fallthrough
CT: control target
= control target key end

     0   :  { %s303_s12 = smov 0   ;;  %s331_s0 = inlined_call_operand.vmem [shape: f32[32,16], index: 0, kind: input, shape index: {}]   ;;  %s332_s1 = inlined_call_operand.vmem [shape: f32[1,16], index: 1, kind: input, shape index: {}]   ;;  %s333_s2 = inlined_call_operand.vmem [shape: f32[1,16], index: 2, kind: input, shape index: {}]   ;;  %s334_s3 = inlined_call_operand.vmem [shape: f32[2,1,16], index: 3, kind: output, shape index: {}]  }
   0x1 LB: > { %s309_s13 = sadd.s32 4294967295, %s281_s12   ;;  %p260_p0 = scmp.ge.s32.totalorder %s281_s12, 1  ;;  %s281_s12 = sphi %s303_s12, %s13_s12  }
   0x2   : > { %p138_p1 = scmp.lt.s32.totalorder %s281_s12, 3 }
   0x4   : > { %p139_p2 = pnand %p260_p0, %p138_p1 }
   0x5   : > { %s261_s14 = sshll.u32 (!%p139_p2), %s309_s13, 1  ;;  %p166_p4 = scmp.lt.s32.totalorder (!%p139_p2), %s309_s13, 1 }
   0x6   : > { %142 = sbr.rel (%p139_p2) target bundleno = 40 (0x28), region = 32  ;;  %p161_p3 = scmp.lt.s32.totalorder (!%p139_p2), %s261_s14, 3 }
   0xb   : > { %s336_s14 = smov (!%p161_p3, %s261_s14), 3  ;;  %v263_v0 = vld [vmem:[%s332_s1] ss:$0 sm:$0xff]  ;;  %vm195_vm0 = vcmask 130048   ;;  %s338_s13 = smov (!%p166_p4, %s309_s13), 1  ;;  %vm207_vm3 = vcmask 122880  }
   0xc   : > { %s262_s15 = sshll.u32 %s336_s14, 3  ;;  %v264_v3 = vld [vmem:[%s333_s2] ss:$0 sm:$0xff]  ;;  %s168_s25 = scalar_lea.vmem %s334_s3, %s338_s13 }
   0xd   : > { %s164_s20 = scalar_lea.vmem %s331_s0, %s262_s15 }
   0xe   : > { %v169_v1 = vld [vmem:[%s164_s20] sm:$0xff]  ;;  %v170_v2 = vld [vmem:[%s164_s20 + $0x8] sm:$0xff] }
   0xf   : > { %v178_v4 = vmul.f32 %v263_v0, %v169_v1  ;;  %v179_v5 = vmul.f32 %v263_v0, %v170_v2 }
  0x11   : > { %v187_v6 = vadd.f32 %v264_v3, %v178_v4  ;;  %v188_v7 = vadd.f32 %v264_v3, %v179_v5 }
  0x13   : > { %vm189_vm1 = vcmp.gt.f32.partialorder %v187_v6, 0.0  ;;  %vm190_vm2 = vcmp.gt.f32.partialorder %v188_v7, 0.0  ;;  %v191_v8 = vmul.f32 0.2, %v187_v6  ;;  %v192_v9 = vmul.f32 0.2, %v188_v7 }
  0x15   : > { %v193_v10 = vsel %vm189_vm1, %v187_v6, %v191_v8  ;;  %v194_v11 = vsel %vm190_vm2, %v188_v7, %v192_v9 }
  0x16   : > { %v196_v12 = vsel %vm195_vm0, %v193_v10, 0.0  ;;  %v197_v13 = vsel %vm195_vm0, %v194_v11, 0.0 }
  0x17   : > { %v198_v14 = vadd.f32 %v197_v13, %v196_v12 }
  0x19   : > { %v199_v15 = vrot.slane %v198_v14, 4 }
  0x1b   : > { %v200_v16 = vadd.f32 %v199_v15, %v198_v14 }
  0x1d   : > { %v201_v17 = vrot.slane %v200_v16, 2 }
  0x1f   : > { %v202_v18 = vadd.f32 %v201_v17, %v200_v16 }
  0x21   : > { %v203_v19 = vrot.slane %v202_v18, 1 }
  0x23   : > { %v204_v20 = vadd.f32 %v203_v19, %v202_v18 }
  0x25   : > { %v206_v21 = vmul.f32 0.0625, %v204_v20 }
  0x27   : > { %208 = vst.msk [vmem:[%s168_s25] sm:$0x1] %vm207_vm3, %v206_v21 }
  0x28 PF: > { %s13_s12 = sadd.s32 1, %s281_s12  }
  0x29   : > { %p10_p5 = scmp.ge.s32.totalorder %s13_s12, 4  }
  0x2b   :  { %12 = sbr.rel (!%p10_p5) target bundleno = 1 (0x1), region = 62 }

// kernel: timestep_predictor.4
= control target key start
LH: loop header
LB: loop body
LE: loop exit
PB: predicated region body
PF: predicated region fallthrough
CT: control target
= control target key end

     0   :  { %s836_s24 = smov 0   ;;  %s907_s0 = inlined_call_operand.vmem [shape: f32[32,8], index: 0, kind: input, shape index: {}]   ;;  %s908_s1 = inlined_call_operand.vmem [shape: f32[3,8,8], index: 1, kind: input, shape index: {}]   ;;  %s909_s2 = inlined_call_operand.vmem [shape: f32[1,8], index: 2, kind: input, shape index: {}]   ;;  %s910_s3 = inlined_call_operand.vmem [shape: f32[16,1], index: 3, kind: input, shape index: {}]   ;;  %s911_s4 = inlined_call_operand.vmem [shape: f32[16,1], index: 4, kind: input, shape index: {}]   ;;  %s912_s5 = inlined_call_operand.vmem [shape: f32[32,8], index: 5, kind: output, shape index: {0}]   ;;  %s913_s6 = inlined_call_operand.vmem [shape: f32[2,1,8], index: 6, kind: output, shape index: {1}]   ;;  %s914_s7 = inlined_call_operand.vmem [shape: f32[2,1,8], index: 7, kind: output, shape index: {2}]  }
   0x1 LB: > { %s842_s25 = sadd.s32 4294967295, %s793_s24   ;;  %p736_p0 = scmp.ge.s32.totalorder %s793_s24, 1  ;;  %s793_s24 = sphi %s836_s24, %s18_s24  }
   0x2   : > { %p243_p1 = scmp.lt.s32.totalorder %s793_s24, 3 }
   0x4   : > { %p244_p2 = pnand %p736_p0, %p243_p1 }
   0x5   : > { %s737_s30 = sshll.u32 (!%p244_p2), %s842_s25, 1  ;;  %p293_p4 = scmp.lt.s32.totalorder (!%p244_p2), %s842_s25, 1 }
   0x6   : > { %247 = sbr.rel (%p244_p2) target bundleno = 364 (0x16c), region = 40  ;;  %p282_p3 = scmp.lt.s32.totalorder (!%p244_p2), %s737_s30, 3 }
   0xb   : > { %v327_v0 = vld [vmem:[%s911_s4] sm:$0xff]  ;;  %v303_v2 = vlaneseq  ;;  %v795_v3 = vmov 0   ;;  %v741_v5 = vld [vmem:[%s908_s1 + $0x8] sm:$0xff]  ;;  %v746_v6 = vld [vmem:[%s908_s1 + $0x10] sm:$0xff]  ;;  %s916_s30 = smov (!%p282_p3, %s737_s30), 3  ;;  %vm344_vm2 = vcmask 64512  }
   0xc   : > { %v308_v1 = vld [vmem:[%s910_s3] sm:$0xff]  ;;  %786 = vset.pattern.permute.xlu1 %v795_v3  ;;  %785 = vset.pattern.permute.xlu0 %v795_v3  ;;  %v328_v7 = vld [vmem:[%s911_s4 + $0x8] sm:$0xff]  ;;  %s738_s18 = sshll.u32 %s916_s30, 3  ;;  %s918_s25 = smov (!%p293_p4, %s842_s25), 1  ;;  %vm610_vm3 = vcmask 57344  }
   0xd   : > { %v343_v4 = vld [vmem:[%s908_s1] sm:$0xff]  ;;  %331 = vperm.xlu1 %786, %v327_v0   ;;  %312 = vperm.xlu0 %785, %v308_v1   ;;  %v309_v8 = vld [vmem:[%s910_s3 + $0x8] sm:$0xff]  ;;  %v304_v9 = vshrl.u32 %v303_v2, 7  ;;  %s285_s21 = scalar_lea.vmem %s907_s0, %s738_s18  ;;  %s291_s28 = scalar_lea.vmem %s912_s5, %s738_s18 }
   0xe   : > { %761 = vmatprep.subr.mxu0 %v343_v4  ;;  %766 = vmatprep.subr.mxu1 %v741_v5  ;;  %v299_v10 = vld [vmem:[%s285_s21] sm:$0xff]  ;;  %v300_v11 = vld [vmem:[%s285_s21 + $0x8] sm:$0xff]  ;;  %s295_s8 = scalar_lea.vmem %s913_s6, %s918_s25  ;;  %s298_s11 = scalar_lea.vmem %s914_s7, %s918_s25 }
   0xf   : > { %762 = vmatpush3.msra.mxu0 %v343_v4  ;;  %767 = vmatpush3.msra.mxu1 %v741_v5  ;;  %vm324_vm0 = vcmp.lt.s32.totalorder %v304_v9, 7  ;;  %vm305_vm1 = vcmp.lt.s32.totalorder %v304_v9, 1  ;;  %v322_v12 = vrot.slane %v299_v10, 1  ;;  %v323_v13 = vrot.slane %v300_v11, 1  ;;  %v749_v34 = vld [vmem:[%s909_s2] ss:$0 sm:$0xff] }
  0x10   : > { %771 = vmatprep.subr.mxu0 %v746_v6  ;;  %v301_v14 = vrot.slane %v299_v10, 7  ;;  %v302_v15 = vrot.slane %v300_v11, 7  ;;  %768 = vmatprep.mubr.msk.f32.mxu1 %vm344_vm2, %v299_v10 }
  0x11   : > { %336 = vperm.xlu1 %786, %v328_v7   ;;  %317 = vperm.xlu0 %785, %v309_v8   ;;  %v325_v16 = vsel %vm324_vm0, %v322_v12, %v323_v13  ;;  %v326_v18 = vsel %vm324_vm0, %v323_v13, %v322_v12 }
  0x12   : > { %769 = vmatmul.mubr.msk.f32.vlgmr.msra.gmra.mxu1 %vm344_vm2, %v300_v11  ;;  %v307_v17 = vsel %vm305_vm1, %v302_v15, %v301_v14  ;;  %v306_v19 = vsel %vm305_vm1, %v301_v14, %v302_v15 }
  0x88   : > { %v332_v20 = vpop.permute.xlu1 %331  ;;  %v313_v21 = vpop.permute.xlu0 %312 }
  0x89   : > { %v320_v22 = vmul.f32 %v313_v21, %v307_v17  ;;  %v339_v23 = vmul.f32 %v332_v20, %v325_v16 }
  0x8b   : > { %763 = vmatprep.mubr.msk.f32.mxu0 %vm344_vm2, %v320_v22 }
  0x8c   : > { %v318_v24 = vpop.permute.xlu0 %317  ;;  %v337_v26 = vpop.permute.xlu1 %336 }
  0x8d   : > { %v321_v25 = vmul.f32 %v318_v24, %v306_v19  ;;  %v340_v27 = vmul.f32 %v337_v26, %v326_v18 }
  0x8f   : > { %764 = vmatmul.mubr.msk.f32.vlgmr.msra.gmra.mxu0 %vm344_vm2, %v321_v25 }
  0x90   : > { %772 = vmatpush3.msra.mxu0 %v746_v6  ;;  %773 = vmatprep.mubr.msk.f32.mxu0 %vm344_vm2, %v339_v23 }
  0x93   : > { %774 = vmatmul.mubr.msk.f32.vlgmr.msra.gmra.mxu0 %vm344_vm2, %v340_v27 }
  0xd2   : > { %v770_v28 = vpop.f32.mrf.mxu1 }
  0xd4   : > { %v498_v31 = vpop.f32.mrf.mxu1 }
 0x14f   : > { %v765_v29 = vpop.f32.mrf.mxu0 }
 0x150   : > { %v504_v32 = vadd.f32 %v770_v28, %v765_v29 }
 0x151   : > { %v417_v30 = vpop.f32.mrf.mxu0 }
 0x152   : > { %v499_v35 = vadd.f32 %v498_v31, %v417_v30 }
 0x153   : > { %v775_v33 = vpop.f32.mrf.mxu0 }
 0x154   : > { %v591_v36 = vadd.f32 %v775_v33, %v504_v32 }
 0x155   : > { %v581_v37 = vpop.f32.mrf.mxu0 }
 0x156   : > { %v600_v38 = vadd.f32 %v749_v34, %v591_v36  ;;  %v590_v39 = vadd.f32 %v581_v37, %v499_v35 }
 0x158   : > { %v613_v40 = vmul.f32 %v600_v38, %v600_v38  ;;  %v599_v41 = vadd.f32 %v749_v34, %v590_v39  ;;  %v602_v42 = vsel %vm344_vm2, %v600_v38, 0.0  ;;  %625 = vst.msk [vmem:[%s291_s28 + $0x8] sm:$0xff] %vm344_vm2, %v600_v38 }
 0x15a   : > { %v601_v43 = vsel %vm344_vm2, %v599_v41, 0.0  ;;  %v612_v44 = vmul.f32 %v599_v41, %v599_v41  ;;  %624 = vst.msk [vmem:[%s291_s28] sm:$0xff] %vm344_vm2, %v599_v41  ;;  %v615_v46 = vsel %vm344_vm2, %v613_v40, 0.0 }
 0x15b   : > { %v603_v45 = vadd.f32 %v602_v42, %v601_v43 }
 0x15c   : > { %v614_v47 = vsel %vm344_vm2, %v612_v44, 0.0 }
 0x15d   : > { %v604_v48 = vrot.slane %v603_v45, 4  ;;  %v616_v49 = vadd.f32 %v615_v46, %v614_v47 }
 0x15f   : > { %v605_v50 = vadd.f32 %v604_v48, %v603_v45  ;;  %v617_v51 = vrot.slane %v616_v49, 4 }
 0x161   : > { %v606_v52 = vrot.slane %v605_v50, 2  ;;  %v618_v53 = vadd.f32 %v617_v51, %v616_v49 }
 0x163   : > { %v607_v54 = vadd.f32 %v606_v52, %v605_v50  ;;  %v619_v55 = vrot.slane %v618_v53, 2 }
 0x165   : > { %v608_v56 = vrot.slane %v607_v54, 1  ;;  %v620_v57 = vadd.f32 %v619_v55, %v618_v53 }
 0x167   : > { %v609_v58 = vadd.f32 %v608_v56, %v607_v54  ;;  %v621_v59 = vrot.slane %v620_v57, 1 }
 0x169   : > { %611 = vst.msk [vmem:[%s295_s8] sm:$0x1] %vm610_vm3, %v609_v58  ;;  %v622_v60 = vadd.f32 %v621_v59, %v620_v57 }
 0x16b   : > { %623 = vst.msk [vmem:[%s298_s11] sm:$0x1] %vm610_vm3, %v622_v60 }
 0x16c PF: > { %s18_s24 = sadd.s32 1, %s793_s24  }
 0x16d   : > { %p15_p5 = scmp.ge.s32.totalorder %s18_s24, 4  }
 0x16f   :  { %17 = sbr.rel (!%p15_p5) target bundleno = 1 (0x1), region = 96 }

// kernel: timestep_predictor.7
= control target key start
LH: loop header
LB: loop body
LE: loop exit
PB: predicated region body
PF: predicated region fallthrough
CT: control target
= control target key end

     0   :  { %v254_v1 = vmov 0.0   ;;  %vm255_vm0 = vmmov 0   ;;  %s313_s0 = inlined_call_operand.vmem [shape: f32[2,16], index: 0, kind: input, shape index: {}]   ;;  %s314_s1 = inlined_call_operand.vmem [shape: f32[16,16], index: 1, kind: input, shape index: {}]   ;;  %s315_s2 = inlined_call_operand.vmem [shape: f32[1,16], index: 2, kind: input, shape index: {}]   ;;  %s316_s3 = inlined_call_operand.vmem [shape: f32[16,128], index: 3, kind: input, shape index: {}]   ;;  %s317_s4 = inlined_call_operand.vmem [shape: f32[1,128], index: 4, kind: input, shape index: {}]   ;;  %s318_s5 = inlined_call_operand.hbm [shape: f32[2,128], index: 5, kind: output, shape index: {}]  }
   0x1   :  { %v23_v0 = vld [vmem:[%s314_s1 + $0x8] sm:$0xff]  ;;  %215 = vmatprep.subr.mxu0 %v254_v1  ;;  %v22_v2 = vld [vmem:[%s314_s1] sm:$0xff]  ;;  %219 = vmatprep.mubr.msk.f32.mxu0 %vm255_vm0, %v254_v1 }
   0x2   :  { %10 = vsyncpa [#allocation3], 0  ;;  %216 = vmatpush3.msra.mxu0 %v23_v0  ;;  %v21_v3 = vld [vmem:[%s313_s0] sm:$0x3]  ;;  %vm31_vm1 = vcmask 130048   ;;  %222 = vmatprep.subr.mxu1 %v254_v1  ;;  %v109_v4 = vld [vmem:[%s316_s3 + $0x8] sm:$0xff] }
   0x3   :  { %217 = vmatprep.subr.mxu0 %v254_v1  ;;  %226 = vmatprep.mubr.msk.f32.mxu1 %vm255_vm0, %v254_v1  ;;  %v108_v5 = vld [vmem:[%s316_s3] sm:$0xff]  ;;  %s256_s30 = smov [#allocation2]  }
   0x4   :  { %218 = vmatpush3.msra.mxu0 %v22_v2  ;;  %223 = vmatpush3.msra.mxu1 %v109_v4  ;;  %v205_v6 = vld [vmem:[%s315_s2] ss:$0 sm:$0xff]  ;;  %s197_s3 = sshll.u32 %s256_s30, 4  ;;  %s198_s3 = int_to_ptr.vmem [resolvable:$true] %s197_s3 }
   0x5   :  { %220 = vmatmul.mubr.msk.f32.vlgmr.msra.gmra.mxu0 %vm31_vm1, %v21_v3  ;;  %224 = vmatprep.subr.mxu1 %v254_v1  ;;  %v207_v12 = vld [vmem:[%s317_s4] ss:$0 sm:$0xff]  ;;  %s232_s2 = scalar_lea.vmem %s198_s3, 32  ;;  %p237_p1 = scmp.lt.s32.totalorder %s198_s3, %s198_s3 }
   0x6   :  { %225 = vmatpush3.msra.mxu1 %v108_v5  ;;  %p233_p0 = scmp.ne.s32.totalorder %s198_s3, %s232_s2  ;;  %p238_p2 = scmp.lt.s32.totalorder %s232_s2, %s232_s2 }
   0x8   :  { %p239_p3 = por %p238_p2, %p237_p1 }
   0xa   :  { %p240_p4 = pnand %p239_p3, %p233_p0 }
  0xc5   :  { %v101_v7 = vpop.f32.mrf.mxu0 }
  0xc6   :  { %v102_v8 = vadd.f32 %v205_v6, %v101_v7 }
  0xc7   :  { %v221_v9 = vpop.f32.mrf.mxu0 }
  0xc8   :  { %vm105_vm2 = vcmp.gt.f32.partialorder %v102_v8, 0.0  ;;  %v106_v10 = vmul.f32 0.2, %v102_v8 }
  0xca   :  { %v107_v11 = vsel %vm105_vm2, %v102_v8, %v106_v10 }
  0xcb   :  { %227 = vmatmul.mubr.msk.f32.vlgmr.msra.gmra.mxu1 %vm31_vm1, %v107_v11 }
 0x18b   :  { %v186_v13 = vpop.f32.mrf.mxu1 }
 0x18c   :  { %v187_v14 = vadd.f32 %v207_v12, %v186_v13 }
 0x18d   :  { %v228_v15 = vpop.f32.mrf.mxu1 }
 0x18e   :  { %190 = vst [vmem:[#allocation2] sm:$0x3] %v187_v14 }
 0x18f   :  { %243 = shalt.err (!%p240_p4)
}
 0x190   :  { %200 = dma.vmem_to_hbm [thread:$0]  %s198_s3, 32, %s318_s5, [#allocation3]  }
 0x191   :  { %252 = dma.done.wait [#allocation3], 32  }
 0x192   :  { %253 = vsyncadd [#allocation3], 4294967264 }
 0x193   :  { %204 = vsyncpa [#allocation3], 1 }

// kernel: timestep_predictor.5
= control target key start
LH: loop header
LB: loop body
LE: loop exit
PB: predicated region body
PF: predicated region fallthrough
CT: control target
= control target key end

     0   :  { %s927_s30 = smov 0   ;;  %s998_s0 = inlined_call_operand.vmem [shape: f32[32,8], index: 0, kind: input, shape index: {}]   ;;  %s999_s1 = inlined_call_operand.vmem [shape: f32[1,8], index: 1, kind: input, shape index: {}]   ;;  %s1000_s2 = inlined_call_operand.vmem [shape: f32[1,8], index: 2, kind: input, shape index: {}]   ;;  %s1001_s3 = inlined_call_operand.vmem [shape: f32[3,8,16], index: 3, kind: input, shape index: {}]   ;;  %s1002_s4 = inlined_call_operand.vmem [shape: f32[1,16], index: 4, kind: input, shape index: {}]   ;;  %s1003_s5 = inlined_call_operand.vmem [shape: f32[16,1], index: 5, kind: input, shape index: {}]   ;;  %s1004_s6 = inlined_call_operand.vmem [shape: f32[16,1], index: 6, kind: input, shape index: {}]   ;;  %s1005_s7 = inlined_call_operand.vmem [shape: f32[32,16], index: 7, kind: output, shape index: {0}]   ;;  %s1006_s8 = inlined_call_operand.vmem [shape: f32[2,1,16], index: 8, kind: output, shape index: {1}]   ;;  %s1007_s9 = inlined_call_operand.vmem [shape: f32[2,1,16], index: 9, kind: output, shape index: {2}]  }
   0x1 LB: > { %s933_s10 = sadd.s32 4294967295, %s874_s30   ;;  %p815_p0 = scmp.ge.s32.totalorder %s874_s30, 1  ;;  %s874_s30 = sphi %s927_s30, %s20_s30  }
   0x2   : > { %p293_p1 = scmp.lt.s32.totalorder %s874_s30, 3 }
   0x4   : > { %p294_p2 = pnand %p815_p0, %p293_p1 }
   0x5   : > { %s816_s15 = sshll.u32 (!%p294_p2), %s933_s10, 1  ;;  %p347_p4 = scmp.lt.s32.totalorder (!%p294_p2), %s933_s10, 1 }
   0x6   : > { %297 = sbr.rel (%p294_p2) target bundleno = 364 (0x16c), region = 48  ;;  %p336_p3 = scmp.lt.s32.totalorder (!%p294_p2), %s816_s15, 3 }
   0xb   : > { %v405_v0 = vld [vmem:[%s1004_s6] sm:$0xff]  ;;  %v876_v2 = vmov 0   ;;  %v822_v4 = vld [vmem:[%s1001_s3 + $0x8] sm:$0xff]  ;;  %v827_v5 = vld [vmem:[%s1001_s3 + $0x10] sm:$0xff]  ;;  %s1009_s15 = smov (!%p336_p3, %s816_s15), 3  ;;  %v381_v9 = vlaneseq  ;;  %vm422_vm2 = vcmask 64512  }
   0xc   : > { %v386_v1 = vld [vmem:[%s1003_s5] sm:$0xff]  ;;  %867 = vset.pattern.permute.xlu1 %v876_v2  ;;  %866 = vset.pattern.permute.xlu0 %v876_v2  ;;  %v406_v6 = vld [vmem:[%s1004_s6 + $0x8] sm:$0xff]  ;;  %s817_s26 = sshll.u32 %s1009_s15, 3  ;;  %vm679_vm5 = vcmask 130048   ;;  %s1011_s10 = smov (!%p347_p4, %s933_s10), 1  ;;  %vm689_vm6 = vcmask 122880  }
   0xd   : > { %409 = vperm.xlu1 %867, %v405_v0   ;;  %390 = vperm.xlu0 %866, %v386_v1   ;;  %v421_v3 = vld [vmem:[%s1001_s3] sm:$0xff]  ;;  %v387_v7 = vld [vmem:[%s1003_s5 + $0x8] sm:$0xff]  ;;  %s339_s12 = scalar_lea.vmem %s998_s0, %s817_s26  ;;  %v382_v17 = vshrl.u32 %v381_v9, 7  ;;  %s345_s20 = scalar_lea.vmem %s1005_s7, %s817_s26 }
   0xe   : > { %842 = vmatprep.subr.mxu0 %v421_v3  ;;  %847 = vmatprep.subr.mxu1 %v822_v4  ;;  %v820_v8 = vld [vmem:[%s999_s1] ss:$0 sm:$0xff]  ;;  %v354_v11 = vld [vmem:[%s339_s12 + $0x8] sm:$0xff]  ;;  %s349_s22 = scalar_lea.vmem %s1006_s8, %s1011_s10  ;;  %s352_s25 = scalar_lea.vmem %s1007_s9, %s1011_s10 }
   0xf   : > { %843 = vmatpush3.msra.mxu0 %v421_v3  ;;  %848 = vmatpush3.msra.mxu1 %v822_v4  ;;  %v353_v10 = vld [vmem:[%s339_s12] sm:$0xff]  ;;  %v363_v14 = vmul.f32 %v820_v8, %v354_v11  ;;  %vm402_vm3 = vcmp.lt.s32.totalorder %v382_v17, 7  ;;  %vm383_vm4 = vcmp.lt.s32.totalorder %v382_v17, 1 }
  0x10   : > { %852 = vmatprep.subr.mxu0 %v827_v5  ;;  %v821_v12 = vld [vmem:[%s1000_s2] ss:$0 sm:$0xff]  ;;  %v362_v13 = vmul.f32 %v820_v8, %v353_v10 }
  0x11   : > { %414 = vperm.xlu1 %867, %v406_v6   ;;  %395 = vperm.xlu0 %866, %v387_v7   ;;  %v372_v16 = vadd.f32 %v821_v12, %v363_v14  ;;  %v830_v44 = vld [vmem:[%s1002_s4] ss:$0 sm:$0xff] }
  0x12   : > { %v371_v15 = vadd.f32 %v821_v12, %v362_v13 }
  0x13   : > { %vm374_vm1 = vcmp.gt.f32.partialorder %v372_v16, 0.0  ;;  %v376_v19 = vmul.f32 0.2, %v372_v16 }
  0x14   : > { %vm373_vm0 = vcmp.gt.f32.partialorder %v371_v15, 0.0  ;;  %v375_v18 = vmul.f32 0.2, %v371_v15 }
  0x15   : > { %v378_v21 = vsel %vm374_vm1, %v372_v16, %v376_v19 }
  0x16   : > { %v377_v20 = vsel %vm373_vm0, %v371_v15, %v375_v18  ;;  %v401_v23 = vrot.slane %v378_v21, 1  ;;  %v380_v25 = vrot.slane %v378_v21, 7 }
  0x17   : > { %v400_v22 = vrot.slane %v377_v20, 1  ;;  %v379_v24 = vrot.slane %v377_v20, 7  ;;  %849 = vmatprep.mubr.msk.f32.mxu1 %vm422_vm2, %v377_v20 }
  0x18   : > { %850 = vmatmul.mubr.msk.f32.vlgmr.msra.gmra.mxu1 %vm422_vm2, %v378_v21 }
  0x19   : > { %v403_v26 = vsel %vm402_vm3, %v400_v22, %v401_v23  ;;  %v385_v27 = vsel %vm383_vm4, %v380_v25, %v379_v24  ;;  %v404_v28 = vsel %vm402_vm3, %v401_v23, %v400_v22  ;;  %v384_v29 = vsel %vm383_vm4, %v379_v24, %v380_v25 }
  0x88   : > { %v410_v30 = vpop.permute.xlu1 %409  ;;  %v391_v31 = vpop.permute.xlu0 %390 }
  0x89   : > { %v398_v32 = vmul.f32 %v391_v31, %v385_v27  ;;  %v417_v33 = vmul.f32 %v410_v30, %v403_v26 }
  0x8b   : > { %844 = vmatprep.mubr.msk.f32.mxu0 %vm422_vm2, %v398_v32 }
  0x8c   : > { %v396_v34 = vpop.permute.xlu0 %395  ;;  %v415_v36 = vpop.permute.xlu1 %414 }
  0x8d   : > { %v399_v35 = vmul.f32 %v396_v34, %v384_v29  ;;  %v418_v37 = vmul.f32 %v415_v36, %v404_v28 }
  0x8f   : > { %845 = vmatmul.mubr.msk.f32.vlgmr.msra.gmra.mxu0 %vm422_vm2, %v399_v35 }
  0x90   : > { %853 = vmatpush3.msra.mxu0 %v827_v5  ;;  %854 = vmatprep.mubr.msk.f32.mxu0 %vm422_vm2, %v417_v33 }
  0x93   : > { %855 = vmatmul.mubr.msk.f32.vlgmr.msra.gmra.mxu0 %vm422_vm2, %v418_v37 }
  0xd8   : > { %v851_v38 = vpop.f32.mrf.mxu1 }
  0xda   : > { %v576_v41 = vpop.f32.mrf.mxu1 }
 0x14f   : > { %v846_v39 = vpop.f32.mrf.mxu0 }
 0x150   : > { %v582_v42 = vadd.f32 %v851_v38, %v846_v39 }
 0x151   : > { %v495_v40 = vpop.f32.mrf.mxu0 }
 0x152   : > { %v577_v45 = vadd.f32 %v576_v41, %v495_v40 }
 0x153   : > { %v856_v43 = vpop.f32.mrf.mxu0 }
 0x154   : > { %v669_v46 = vadd.f32 %v856_v43, %v582_v42 }
 0x155   : > { %v659_v47 = vpop.f32.mrf.mxu0 }
 0x156   : > { %v678_v48 = vadd.f32 %v830_v44, %v669_v46  ;;  %v668_v49 = vadd.f32 %v659_v47, %v577_v45 }
 0x158   : > { %v692_v50 = vmul.f32 %v678_v48, %v678_v48  ;;  %v677_v51 = vadd.f32 %v830_v44, %v668_v49  ;;  %v681_v52 = vsel %vm679_vm5, %v678_v48, 0.0  ;;  %704 = vst.msk [vmem:[%s345_s20 + $0x8] sm:$0xff] %vm679_vm5, %v678_v48 }
 0x15a   : > { %v680_v53 = vsel %vm679_vm5, %v677_v51, 0.0  ;;  %v691_v54 = vmul.f32 %v677_v51, %v677_v51  ;;  %703 = vst.msk [vmem:[%s345_s20] sm:$0xff] %vm679_vm5, %v677_v51  ;;  %v694_v56 = vsel %vm679_vm5, %v692_v50, 0.0 }
 0x15b   : > { %v682_v55 = vadd.f32 %v681_v52, %v680_v53 }
 0x15c   : > { %v693_v57 = vsel %vm679_vm5, %v691_v54, 0.0 }
 0x15d   : > { %v683_v58 = vrot.slane %v682_v55, 4  ;;  %v695_v59 = vadd.f32 %v694_v56, %v693_v57 }
 0x15f   : > { %v684_v60 = vadd.f32 %v683_v58, %v682_v55  ;;  %v696_v61 = vrot.slane %v695_v59, 4 }
 0x161   : > { %v685_v62 = vrot.slane %v684_v60, 2  ;;  %v697_v63 = vadd.f32 %v696_v61, %v695_v59 }
 0x163   : > { %v686_v0 = vadd.f32 %v685_v62, %v684_v60  ;;  %v698_v1 = vrot.slane %v697_v63, 2 }
 0x165   : > { %v687_v2 = vrot.slane %v686_v0, 1  ;;  %v699_v3 = vadd.f32 %v698_v1, %v697_v63 }
 0x167   : > { %v688_v4 = vadd.f32 %v687_v2, %v686_v0  ;;  %v700_v5 = vrot.slane %v699_v3, 1 }
 0x169   : > { %690 = vst.msk [vmem:[%s349_s22] sm:$0x1] %vm689_vm6, %v688_v4  ;;  %v701_v6 = vadd.f32 %v700_v5, %v699_v3 }
 0x16b   : > { %702 = vst.msk [vmem:[%s352_s25] sm:$0x1] %vm689_vm6, %v701_v6 }
 0x16c PF: > { %s20_s30 = sadd.s32 1, %s874_s30  }
 0x16d   : > { %p17_p5 = scmp.ge.s32.totalorder %s20_s30, 4  }
 0x16f   :  { %19 = sbr.rel (!%p17_p5) target bundleno = 1 (0x1), region = 104 }

</bundles_post_ra>
